<compile_context>
chip_gen: v5e
topology: v5e:2x2
jax: 0.10.0
libtpu: 0.0.40
codegen_flags: <defaults>
</compile_context>

<pallas_src>
import jax
import jax.numpy as jnp
from jax.experimental import pallas as pl
from jax.experimental.pallas import tpu as pltpu

SPIKE_THRESHOLD = 0.5


def _agi_neuromorphic_kernel(x_ref, w_syn_ref, w_cog_ref, b_cog_ref, out_ref):
    # Spiking stage: bf16 MXU matmul (f32 accumulation), Heaviside on the VPU.
    x_bf16 = x_ref[...].astype(jnp.bfloat16)
    membrane = jnp.dot(x_bf16, w_syn_ref[...],
                       preferred_element_type=jnp.float32)
    spikes = (membrane > SPIKE_THRESHOLD).astype(jnp.bfloat16)  # exact {0, 1}

    # Cognitive stage: bf16 MXU matmul, f32 accumulation, bias + tanh (EUP).
    insights = jnp.dot(spikes, w_cog_ref[...],
                       preferred_element_type=jnp.float32)
    out_ref[...] = jnp.tanh(insights + b_cog_ref[...]).astype(out_ref.dtype)


def _resident_spec(shape):
    """BlockSpec for a weight that stays resident across all batch tiles.

    Constant index_map -> the block never changes between grid steps; request
    single buffering so resident weights don't pay 2x VMEM (matters once
    num_neurons/num_synapses grow, especially on v7x's 64 MiB VMEM).
    """
    try:
        return pl.BlockSpec(shape, lambda i: (0, 0),
                            pipeline_mode=pl.Buffered(1))
    except TypeError:  # older jax without pipeline_mode: default double-buffer
        return pl.BlockSpec(shape, lambda i: (0, 0))


def agi_neuromorphic_forward(inputs, w_syn, w_cog, b_cog, *,
                             tile_b=512, min_grid_steps=2,
                             out_dtype=jnp.float32):
    """Fused spiking + reasoning forward pass.

    inputs: (B, num_neurons) f32 or bf16
    w_syn : (num_neurons, num_synapses)  (cast to bf16 for the MXU)
    w_cog : (num_synapses, num_neurons)  (cast to bf16 for the MXU)
    b_cog : (1, num_neurons) f32
    returns insights: (B, num_neurons) out_dtype
    """
    b, n_neurons = inputs.shape
    n_syn = w_syn.shape[1]
    assert w_syn.shape == (n_neurons, n_syn)
    assert w_cog.shape == (n_syn, n_neurons)
    assert b_cog.shape == (1, n_neurons)

    # --- batch tiling -------------------------------------------------------
    # Small problems: one full-array block (block dim == array dim is always a
    # legal BlockSpec shape, even below 8).
    if b <= 8:
        tb = b
    else:
        # Keep >= min_grid_steps grid steps so the "parallel" batch axis can be
        # sharded across v7x's two TensorCores; round each tile up to a
        # sublane multiple for the (8, 128) BlockSpec constraint; cap at
        # tile_b.  No padding is materialized — Pallas masks the partial last
        # block (safe because the contraction axis is the feature axis).
        per_step = -(-b // max(min_grid_steps, 1))        # ceil(b / steps)
        per_step = ((per_step + 7) // 8) * 8              # round up to 8
        tb = max(8, min(tile_b, per_step))
    grid_b = pl.cdiv(b, tb)
    assert tb == b or tb % 8 == 0, "batch tile must be a sublane multiple"

    # Spikes are exactly {0,1}; bf16 weights + f32 MXU accumulation everywhere.
    w_syn_bf16 = w_syn.astype(jnp.bfloat16)
    w_cog_bf16 = w_cog.astype(jnp.bfloat16)
    b_cog_f32 = b_cog.astype(jnp.float32)

    x_bytes = b * n_neurons * jnp.dtype(inputs.dtype).itemsize
    out_bytes = b * n_neurons * jnp.dtype(out_dtype).itemsize
    cost = pl.CostEstimate(
        flops=4 * b * n_neurons * n_syn,                 # two (B,N,S) matmuls
        transcendentals=b * n_neurons,                   # tanh
        bytes_accessed=(x_bytes                          # inputs
                        + n_neurons * n_syn * 2          # w_syn (bf16)
                        + n_syn * n_neurons * 2          # w_cog (bf16)
                        + n_neurons * 4                  # b_cog
                        + out_bytes))                    # output

    return pl.pallas_call(
        _agi_neuromorphic_kernel,
        out_shape=jax.ShapeDtypeStruct((b, n_neurons), out_dtype),
        grid_spec=pltpu.PrefetchScalarGridSpec(
            num_scalar_prefetch=0,
            grid=(grid_b,),
            in_specs=[
                # Batch-tiled activations (pipelined against compute).
                pl.BlockSpec((tb, n_neurons), lambda i: (i, 0)),
                # Weights/bias: constant index_map -> resident across tiles.
                _resident_spec((n_neurons, n_syn)),
                _resident_spec((n_syn, n_neurons)),
                _resident_spec((1, n_neurons)),
            ],
            out_specs=pl.BlockSpec((tb, n_neurons), lambda i: (i, 0)),
        ),
        compiler_params=pltpu.CompilerParams(
            dimension_semantics=("parallel",),           # megacore on v7x
            vmem_limit_bytes=32 * 1024 * 1024),          # v5e default is 16 MiB
        cost_estimate=cost,
    )(inputs, w_syn_bf16, w_cog_bf16, b_cog_f32)


def _reference(inputs, w_syn, w_cog, b_cog):
    # Matches kernel numerics: bf16 operands, f32 MXU accumulation, f32 epilogue.
    membrane = jnp.dot(inputs.astype(jnp.bfloat16), w_syn.astype(jnp.bfloat16),
                       preferred_element_type=jnp.float32)
    spikes = (membrane > SPIKE_THRESHOLD).astype(jnp.bfloat16)
    insights = jnp.dot(spikes, w_cog.astype(jnp.bfloat16),
                       preferred_element_type=jnp.float32)
    return jnp.tanh(insights + b_cog.astype(jnp.float32))


if __name__ == "__main__":
    # Shapes consistent with the module: num_neurons=128, num_synapses=256.
    # batch=256 -> two 128-row tiles (pipelined; both v7x TCs busy).
    batch, num_neurons, num_synapses = 256, 128, 256

    key = jax.random.PRNGKey(0)
    k_x, k_syn, k_cog, k_b = jax.random.split(key, 4)

    x = jax.random.normal(k_x, (batch, num_neurons), dtype=jnp.float32)
    # Deterministic synthetic parameter init (scaled normal).
    w_syn = jax.random.normal(k_syn, (num_neurons, num_synapses),
                              dtype=jnp.float32) * (1.0 / jnp.sqrt(num_neurons))
    w_cog = jax.random.normal(k_cog, (num_synapses, num_neurons),
                              dtype=jnp.float32) * (1.0 / jnp.sqrt(num_synapses))
    b_cog = jax.random.normal(k_b, (1, num_neurons), dtype=jnp.float32) * 0.01

    out = agi_neuromorphic_forward(x, w_syn, w_cog, b_cog)
    out = jax.block_until_ready(out)

    ref = _reference(x, w_syn, w_cog, b_cog)
    assert out.shape == (batch, num_neurons)
    assert jnp.allclose(out, ref, atol=1e-4, rtol=1e-4), "mismatch vs JAX reference"

    print("KERNEL_OK")
</pallas_src>

<mosaic_0001>
module attributes {stable_mosaic.version = 11 : i64} {
  func.func @_agi_neuromorphic_kernel(%arg0: i32, %arg1: memref<128x128xf32, #tpu.memory_space<vmem>>, %arg2: memref<128x256xbf16, #tpu.memory_space<vmem>>, %arg3: memref<256x128xbf16, #tpu.memory_space<vmem>>, %arg4: memref<1x128xf32, #tpu.memory_space<vmem>>, %arg5: memref<128x128xf32, #tpu.memory_space<vmem>>) attributes {dimension_semantics = [#tpu.dimension_semantics<parallel>], iteration_bounds = array<i64: 2>, scalar_prefetch = 0 : i64, scratch_operands = 0 : i64, tpu.core_type = #tpu.core_type<tc>, window_params = [{transform_indices = @transform_0, window_bounds = array<i64: 128, 128>}, {pipeline_mode = #tpu.pipeline_mode<synchronous>, transform_indices = @transform_1, window_bounds = array<i64: 128, 256>}, {pipeline_mode = #tpu.pipeline_mode<synchronous>, transform_indices = @transform_2, window_bounds = array<i64: 256, 128>}, {pipeline_mode = #tpu.pipeline_mode<synchronous>, transform_indices = @transform_3, window_bounds = array<i64: 1, 128>}, {transform_indices = @transform_4, window_bounds = array<i64: 128, 128>}]} {
    %c0 = arith.constant 0 : index
    %c0_0 = arith.constant 0 : index
    %0 = vector.load %arg1[%c0, %c0_0] : memref<128x128xf32, #tpu.memory_space<vmem>>, vector<128x128xf32>
    %1 = arith.truncf %0 : vector<128x128xf32> to vector<128x128xbf16>
    %c0_1 = arith.constant 0 : index
    %c0_2 = arith.constant 0 : index
    %2 = vector.load %arg2[%c0_1, %c0_2] : memref<128x256xbf16, #tpu.memory_space<vmem>>, vector<128x256xbf16>
    %cst = arith.constant dense<0.000000e+00> : vector<128x256xf32>
    %3 = tpu.matmul %1, %2, %cst {dimension_numbers = #tpu.dot_dimension_numbers<[1], [0], [0], [1], [0, 0, 1, 1], [], []>} : vector<128x128xbf16>, vector<128x256xbf16>, vector<128x256xf32> -> vector<128x256xf32>
    %cst_3 = arith.constant 5.000000e-01 : f32
    %4 = vector.broadcast %cst_3 : f32 to vector<128x256xf32>
    %5 = arith.cmpf ogt, %3, %4 : vector<128x256xf32>
    %6 = arith.extui %5 : vector<128x256xi1> to vector<128x256xi32>
    %7 = arith.sitofp %6 : vector<128x256xi32> to vector<128x256xf32>
    %8 = arith.truncf %7 : vector<128x256xf32> to vector<128x256xbf16>
    %c0_4 = arith.constant 0 : index
    %c0_5 = arith.constant 0 : index
    %9 = vector.load %arg3[%c0_4, %c0_5] : memref<256x128xbf16, #tpu.memory_space<vmem>>, vector<256x128xbf16>
    %cst_6 = arith.constant dense<0.000000e+00> : vector<128x128xf32>
    %10 = tpu.matmul %8, %9, %cst_6 {dimension_numbers = #tpu.dot_dimension_numbers<[1], [0], [0], [1], [0, 0, 1, 1], [], []>} : vector<128x256xbf16>, vector<256x128xbf16>, vector<128x128xf32> -> vector<128x128xf32>
    %c0_7 = arith.constant 0 : index
    %c0_8 = arith.constant 0 : index
    %11 = vector.load %arg4[%c0_7, %c0_8] : memref<1x128xf32, #tpu.memory_space<vmem>>, vector<1x128xf32>
    %12 = vector.broadcast %11 : vector<1x128xf32> to vector<128x128xf32>
    %13 = arith.addf %10, %12 : vector<128x128xf32>
    %14 = math.tanh %13 : vector<128x128xf32>
    %c0_9 = arith.constant 0 : index
    %c0_10 = arith.constant 0 : index
    %15 = vector.load %arg5[%c0_9, %c0_10] : memref<128x128xf32, #tpu.memory_space<vmem>>, vector<128x128xf32>
    tpu.vector_store %arg5[%c0_9, %c0_10], %14 {strides = array<i32>} : memref<128x128xf32, #tpu.memory_space<vmem>>, vector<128x128xf32>,
    return
  }
  func.func @transform_0(%arg0: i32) -> (i32, i32) {
    %c0_i32 = arith.constant 0 : i32
    %c0_i32_0 = arith.constant 0 : i32
    return %arg0, %c0_i32 : i32, i32
  }
  func.func @transform_1(%arg0: i32) -> (i32, i32) {
    %c0_i32 = arith.constant 0 : i32
    %c0_i32_0 = arith.constant 0 : i32
    %c0_i32_1 = arith.constant 0 : i32
    return %c0_i32, %c0_i32_0 : i32, i32
  }
  func.func @transform_2(%arg0: i32) -> (i32, i32) {
    %c0_i32 = arith.constant 0 : i32
    %c0_i32_0 = arith.constant 0 : i32
    %c0_i32_1 = arith.constant 0 : i32
    return %c0_i32, %c0_i32_0 : i32, i32
  }
  func.func @transform_3(%arg0: i32) -> (i32, i32) {
    %c0_i32 = arith.constant 0 : i32
    %c0_i32_0 = arith.constant 0 : i32
    %c0_i32_1 = arith.constant 0 : i32
    return %c0_i32, %c0_i32_0 : i32, i32
  }
  func.func @transform_4(%arg0: i32) -> (i32, i32) {
    %c0_i32 = arith.constant 0 : i32
    %c0_i32_0 = arith.constant 0 : i32
    return %arg0, %c0_i32 : i32, i32
  }
}

</mosaic_0001>

<bundles_post_ra>
// kernel: tpu_custom_call.1
= control target key start
LH: loop header
LB: loop body
LE: loop exit
PB: predicated region body
PF: predicated region fallthrough
CT: control target
= control target key end

     0   :  { %9 = vsyncpa [#allocation3], 0  ;;  %s1725_s0 = inlined_call_operand.hbm [shape: f32[256,128], index: 0, kind: input, shape index: {}]   ;;  %s1726_s1 = inlined_call_operand.hbm [shape: bf16[128,256], index: 1, kind: input, shape index: {}]   ;;  %s1727_s2 = inlined_call_operand.hbm [shape: bf16[256,128], index: 2, kind: input, shape index: {}]   ;;  %s1728_s3 = inlined_call_operand.vmem [shape: f32[1,128], index: 3, kind: input, shape index: {}]   ;;  %s1729_s4 = inlined_call_operand.hbm [shape: f32[256,128], index: 4, kind: output, shape index: {}]  }
   0x1   :  { %11 = vsyncpa [#allocation3 + $0x1], 0 }
   0x2   :  { %12 = vsyncpa [#allocation6], 0 }
   0x3   :  { %13 = vsyncpa [#allocation4], 0 }
   0x4   :  { %15 = vsyncpa [#allocation4 + $0x1], 0  ;;  %s1500_s15 = smov 0   ;;  %s1502_s16 = smov 0  }
   0x5   :  { %s1504_s17 = smov 0   ;;  %s1506_s18 = smov 0  }
   0x6 LB: > { %s1521_s19 = sadd.s32 4294967295, %s1464_s18   ;;  %s953_s20 = sadd.s32 4294967294, %s1464_s18   ;;  %s1464_s18 = sphi %s1506_s18, %s1739_s18   ;;  %s1460_s17 = sphi %s1504_s17, %s1738_s17   ;;  %s1456_s16 = sphi %s1502_s16, %s1737_s16   ;;  %s1452_s15 = sphi %s1500_s15, %s1736_s15  }
   0x7   : > { %p41_p0 = scmp.ne.s32.totalorder %s1456_s16, %s1452_s15  ;;  %p42_p1 = scmp.eq.s32.totalorder %s1521_s19, 0 }
   0x8   : > { %p128_p2 = scmp.eq.s32.totalorder %s1521_s19, 1  ;;  %p134_p3 = scmp.eq.s32.totalorder %s953_s20, 1 }
   0x9   : > { %p1530_p4 = por %p42_p1, %p41_p0  ;;  %p954_p5 = scmp.ge.s32.totalorder %s1464_s18, 1 }
   0xa   : > { %p1535_p6 = por %p134_p3, %p41_p0  ;;  %p141_p7 = scmp.lt.s32.totalorder %s1464_s18, 3 }
   0xb   : > { %s152_s25 = sshll.u32 %s1726_s1, 4  ;;  %s1466_s27 = smov [#allocation5]   ;;  %s153_s25 = int_to_ptr.hbm [resolvable:$true] %s152_s25 }
   0xc   : > { %p1543_p8 = pnand %p954_p5, %p141_p7  ;;  %s154_s28 = sshll.u32 %s1466_s27, 4  ;;  %s155_s28 = int_to_ptr.vmem [resolvable:$true] %s154_s28 }
   0xd   : > { %s166_s5 = sshll.u32 %s1727_s2, 4  ;;  %s1467_s6 = smov 128   ;;  %s167_s5 = int_to_ptr.hbm [resolvable:$true] %s166_s5 }
   0xe   : > { %p1209_p9 = pneg %p1543_p8  ;;  %s1468_s7 = smov 8  }
   0xf   : > { %s1469_s8 = smov [#allocation7]   ;;  %s1470_s10 = smov 64  }
  0x10   : > { %p1210_p10 = pnand %p1209_p9, %p42_p1  ;;  %s168_s9 = sshll.u32 %s1469_s8, 4  ;;  %s169_s9 = int_to_ptr.vmem [resolvable:$true] %s168_s9 }
  0x11   : > { %s1471_s11 = smov 4   ;;  %s1559_s12 = sadd.s32 1, %s1464_s18  }
  0x12   : > { %1212 = dma.hbm_to_vmem [thread:$0]  (!%p1210_p10), %s153_s25, 2048, %s155_s28, [#allocation6], %s1467_s6, %s1467_s6, %s1468_s7  }
  0x13   : > { %1215 = dma.hbm_to_vmem [thread:$0]  (!%p1210_p10), %s167_s5, 2048, %s169_s9, [#allocation6], %s1470_s10, %s1470_s10, %s1471_s11  }
  0x14   : > { %s25_s13 = ssub.s32 %s1464_s18, %s1559_s12  ;;  %s28_s14 = sadd.s32 1, %s1460_s17 }
  0x15   : > { %p26_p12 = scmp.eq.s32.totalorder %s25_s13, 0  ;;  %p35_p13 = scmp.ne.s32.totalorder %s1460_s17, %s1456_s16 }
  0x16   : > { %p36_p0 = scmp.eq.s32.totalorder %s1464_s18, 0  ;;  %p1226_p7 = scmp.lt.s32.totalorder %s1464_s18, 2 }
  0x17   : > { %s1568_s20 = scalar_select %p26_p12, %s1460_s17, %s28_s14  }
  0x18   : > { %p37_p3 = por %p36_p0, %p35_p13  ;;  %p1572_p5 = por %p128_p2, %p35_p13 }
  0x19   : > { %s185_s24 = sand.u32 1, %s1460_s17   ;;  %s1163_s27 = sshll.u32 %s1464_s18, 7 }
  0x1a   : > { %s958_s25 = sshll.u32 %s185_s24, 7  ;;  %s194_s30 = scalar_lea.hbm %s1725_s0, %s1163_s27 }
  0x1b   : > { %s189_s5 = scalar_lea.vmem [#allocation2], %s958_s25  ;;  %s195_s9 = sshll.u32 %s194_s30, 4  ;;  %s196_s9 = int_to_ptr.hbm [resolvable:$true] %s195_s9 }
  0x1c   : > { %s197_s8 = sshll.u32 %s189_s5, 4  ;;  %p1582_p9 = pnand %p1226_p7, %p37_p3  ;;  %s198_s8 = int_to_ptr.vmem [resolvable:$true] %s197_s8 }
  0x1d   : > { %s186_s11 = scalar_lea.sflag [#allocation3], %s185_s24  ;;  %s1364_s13 = sshra.s32 %s196_s9, 4  ;;  %s1365_s13 = int_to_ptr.hbm [resolvable:$true] %s1364_s13 }
  0x1e   : > { %s1366_s14 = scalar_lea.hbm %s1365_s13, 128  ;;  %p1368_p10 = pneg %p1582_p9 }
  0x1f   : > { %p1367_p2 = scmp.ne.s32.totalorder %s1365_s13, %s1366_s14  ;;  %s1371_s28 = scalar_lea.hbm %s1725_s0, 256 }
  0x20   : > { %p1372_p0 = scmp.lt.s32.totalorder %s1365_s13, %s1725_s0  ;;  %p1373_p3 = scmp.lt.s32.totalorder %s1371_s28, %s1366_s14 }
  0x21   : > { %p1369_p12 = pnand %p1368_p10, %p1367_p2 }
  0x22   : > { %p1374_p7 = por %p1373_p3, %p1372_p0 }
  0x23   : > { %p1370_p13 = pneg %p1369_p12 }
  0x25   : > { %p1375_p11 = pnand %p1374_p7, %p1370_p13 }
  0x27   : > { %1378 = shalt.err (!%p1375_p11)
}
  0x28   : > { %1219 = dma.hbm_to_vmem [thread:$0]  (!%p1582_p9), %s196_s9, 2048, %s198_s8, %s186_s11, %s1467_s6, %s1467_s6, %s1468_s7  }
  0x29   : > { %209 = sbr.rel (%p1543_p8) target bundleno = 486 (0x1e6), region = 36  ;;  %s1602_s24 = sand.u32 (!%p1543_p8), 1, %s1456_s16  }
  0x2a   : > { %s962_s5 = sshll.u32 (!%p1543_p8), %s1602_s24, 7  ;;  %s212_s13 = scalar_lea.sflag (!%p1543_p8), [#allocation3], %s1602_s24 }
  0x2b   : > { %s1608_s14 = scalar_lea.vmem (!%p1543_p8), [#allocation2], %s962_s5 }
  0x2e   : > { %1439 = dma.done.wait (%p1530_p4), %s212_s13, 2048  }
  0x2f   : > { %1441 = vsyncadd (%p1530_p4), %s212_s13, 4294965248 }
  0x30   : > { %1443 = dma.done.wait (%p42_p1), [#allocation6], 4096  }
  0x31   : > { %1445 = vsyncadd (%p42_p1), [#allocation6], 4294963200  ;;  %v1024_v0 = vld [vmem:[#allocation5 + $0x70] sm:$0xf]  ;;  %v1179_v1 = vld [vmem:[#allocation5 + $0x74] sm:$0xf0] }
  0x32   : > { %v1178_v2 = vld [vmem:[#allocation5 + $0x74] sm:$0xf]  ;;  %v1025_v3 = vor.u32 %v1179_v1, %v1024_v0  ;;  %v1026_v4 = vld [vmem:[#allocation5 + $0x78] sm:$0xf0]  ;;  %v1016_v5 = vld [vmem:[#allocation5 + $0x60] sm:$0xf] }
  0x33   : > { %v1177_v6 = vld [vmem:[#allocation5 + $0x64] sm:$0xf0]  ;;  %v1029_v7 = vor.u32 %v1178_v2, %v1026_v4  ;;  %v1176_v8 = vld [vmem:[#allocation5 + $0x64] sm:$0xf]  ;;  %v1018_v9 = vld [vmem:[#allocation5 + $0x68] sm:$0xf0] }
  0x34   : > { %373 = vmatpush.bf16.msra.mxu0 %v1025_v3  ;;  %v1017_v10 = vor.u32 %v1177_v6, %v1016_v5  ;;  %v1021_v11 = vor.u32 %v1176_v8, %v1018_v9  ;;  %v1008_v12 = vld [vmem:[#allocation5 + $0x50] sm:$0xf]  ;;  %v1175_v13 = vld [vmem:[#allocation5 + $0x54] sm:$0xf0]  ;;  %v1174_v14 = vld [vmem:[#allocation5 + $0x54] sm:$0xf] }
  0x35   : > { %422 = vmatpush.bf16.msra.mxu1 %v1029_v7  ;;  %v1010_v15 = vld [vmem:[#allocation5 + $0x58] sm:$0xf0]  ;;  %v1009_v16 = vor.u32 %v1175_v13, %v1008_v12  ;;  %v1000_v18 = vld [vmem:[#allocation5 + $0x40] sm:$0xf]  ;;  %v1173_v19 = vld [vmem:[#allocation5 + $0x44] sm:$0xf0] }
  0x36   : > { %v1013_v17 = vor.u32 %v1174_v14, %v1010_v15  ;;  %v1172_v20 = vld [vmem:[#allocation5 + $0x44] sm:$0xf]  ;;  %v1002_v21 = vld [vmem:[#allocation5 + $0x48] sm:$0xf0]  ;;  %v1001_v22 = vor.u32 %v1173_v19, %v1000_v18  ;;  %v992_v24 = vld [vmem:[#allocation5 + $0x30] sm:$0xf] }
  0x37   : > { %v1005_v23 = vor.u32 %v1172_v20, %v1002_v21  ;;  %v1171_v25 = vld [vmem:[#allocation5 + $0x34] sm:$0xf0]  ;;  %v1170_v26 = vld [vmem:[#allocation5 + $0x34] sm:$0xf]  ;;  %v994_v27 = vld [vmem:[#allocation5 + $0x38] sm:$0xf0] }
  0x38   : > { %374 = vmatpush.bf16.msra.mxu0 %v1017_v10  ;;  %v993_v28 = vor.u32 %v1171_v25, %v992_v24  ;;  %v997_v29 = vor.u32 %v1170_v26, %v994_v27  ;;  %v984_v30 = vld [vmem:[#allocation5 + $0x20] sm:$0xf]  ;;  %v1169_v31 = vld [vmem:[#allocation5 + $0x24] sm:$0xf0]  ;;  %v1168_v32 = vld [vmem:[#allocation5 + $0x24] sm:$0xf] }
  0x39   : > { %423 = vmatpush.bf16.msra.mxu1 %v1021_v11  ;;  %v986_v33 = vld [vmem:[#allocation5 + $0x28] sm:$0xf0]  ;;  %v985_v34 = vor.u32 %v1169_v31, %v984_v30  ;;  %v976_v36 = vld [vmem:[#allocation5 + $0x10] sm:$0xf]  ;;  %v1167_v37 = vld [vmem:[#allocation5 + $0x14] sm:$0xf0] }
  0x3a   : > { %v989_v35 = vor.u32 %v1168_v32, %v986_v33  ;;  %v1166_v38 = vld [vmem:[#allocation5 + $0x14] sm:$0xf]  ;;  %v978_v39 = vld [vmem:[#allocation5 + $0x18] sm:$0xf0]  ;;  %v977_v40 = vor.u32 %v1167_v37, %v976_v36  ;;  %v968_v42 = vld [vmem:[#allocation5] sm:$0xf] }
  0x3b   : > { %v981_v41 = vor.u32 %v1166_v38, %v978_v39  ;;  %v1165_v43 = vld [vmem:[#allocation5 + $0x4] sm:$0xf0]  ;;  %v1164_v44 = vld [vmem:[#allocation5 + $0x4] sm:$0xf]  ;;  %v970_v45 = vld [vmem:[#allocation5 + $0x8] sm:$0xf0] }
  0x3c   : > { %375 = vmatpush.bf16.msra.mxu0 %v1009_v16  ;;  %v969_v46 = vor.u32 %v1165_v43, %v968_v42  ;;  %v253_v47 = vld [vmem:[%s1608_s14] sm:$0xff]  ;;  %v254_v48 = vld [vmem:[%s1608_s14 + $0x8] sm:$0xff]  ;;  %v973_v49 = vor.u32 %v1164_v44, %v970_v45  ;;  %v255_v51 = vld [vmem:[%s1608_s14 + $0x10] sm:$0xff]  ;;  %s1659_s6 = scalar_lea.vmem [#allocation8], %s962_s5  ;;  %s1196_s7 = sshll.u32 %s1521_s19, 7 }
  0x3d   : > { %424 = vmatpush.bf16.msra.mxu1 %v1013_v17  ;;  %v269_v50 = vpack.c.bf16 %v254_v48, %v253_v47  ;;  %v256_v52 = vld [vmem:[%s1608_s14 + $0x18] sm:$0xff]  ;;  %v257_v54 = vld [vmem:[%s1608_s14 + $0x20] sm:$0xff]  ;;  %v258_v55 = vld [vmem:[%s1608_s14 + $0x28] sm:$0xff]  ;;  %s857_s10 = scalar_lea.hbm %s1729_s4, %s1196_s7  ;;  %s858_s11 = sshll.u32 %s1659_s6, 4  ;;  %s859_s11 = int_to_ptr.vmem [resolvable:$true] %s858_s11 }
  0x3e   : > { %v270_v53 = vpack.c.bf16 %v256_v52, %v255_v51  ;;  %v271_v56 = vpack.c.bf16 %v258_v55, %v257_v54  ;;  %v259_v57 = vld [vmem:[%s1608_s14 + $0x30] sm:$0xff]  ;;  %v260_v58 = vld [vmem:[%s1608_s14 + $0x38] sm:$0xff]  ;;  %v261_v60 = vld [vmem:[%s1608_s14 + $0x40] sm:$0xff]  ;;  %s860_s27 = sshll.u32 %s857_s10, 4  ;;  %s846_s25 = scalar_lea.sflag [#allocation4], %s1602_s24  ;;  %s861_s27 = int_to_ptr.hbm [resolvable:$true] %s860_s27 }
  0x3f   : > { %v272_v59 = vpack.c.bf16 %v260_v58, %v259_v57  ;;  %v262_v61 = vld [vmem:[%s1608_s14 + $0x48] sm:$0xff]  ;;  %v1187_v63 = vld [vmem:[#allocation7 + $0x38] sm:$0xff]  ;;  %v1186_v1 = vld [vmem:[#allocation7 + $0x30] sm:$0xff]  ;;  %s1408_s19 = sshra.s32 %s861_s27, 4  ;;  %s1414_s5 = scalar_lea.hbm %s1729_s4, 256  ;;  %s1409_s19 = int_to_ptr.hbm [resolvable:$true] %s1408_s19 }
  0x40   : > { %376 = vmatpush.bf16.msra.mxu0 %v1001_v22  ;;  %v273_v62 = vpack.c.bf16 %v262_v61, %v261_v60  ;;  %v1195_v0 = vld [vmem:[#allocation7 + $0x78] sm:$0xff]  ;;  %715 = vmatpush.bf16.msra.mxu2 %v1187_v63  ;;  %v1194_v2 = vld [vmem:[#allocation7 + $0x70] sm:$0xff]  ;;  %v1185_v6 = vld [vmem:[#allocation7 + $0x28] sm:$0xff]  ;;  %s1410_s28 = scalar_lea.hbm %s1409_s19, 128  ;;  %p1415_p11 = scmp.lt.s32.totalorder %s1409_s19, %s1729_s4 }
  0x41   : > { %425 = vmatpush.bf16.msra.mxu1 %v1005_v23  ;;  %764 = vmatpush.bf16.msra.mxu3 %v1195_v0  ;;  %v263_v3 = vld [vmem:[%s1608_s14 + $0x50] sm:$0xff]  ;;  %v264_v4 = vld [vmem:[%s1608_s14 + $0x58] sm:$0xff]  ;;  %v1193_v7 = vld [vmem:[#allocation7 + $0x68] sm:$0xff]  ;;  %p1411_p1 = scmp.ne.s32.totalorder %s1409_s19, %s1410_s28  ;;  %p1416_p9 = scmp.lt.s32.totalorder %s1414_s5, %s1410_s28 }
  0x42   : > { %v274_v5 = vpack.c.bf16 %v264_v4, %v263_v3  ;;  %v1184_v8 = vld [vmem:[#allocation7 + $0x20] sm:$0xff]  ;;  %v1183_v10 = vld [vmem:[#allocation7 + $0x18] sm:$0xff]  ;;  %v266_v13 = vld [vmem:[%s1608_s14 + $0x68] sm:$0xff] }
  0x43   : > { %v1192_v9 = vld [vmem:[#allocation7 + $0x60] sm:$0xff]  ;;  %v1191_v11 = vld [vmem:[#allocation7 + $0x58] sm:$0xff]  ;;  %v1182_v15 = vld [vmem:[#allocation7 + $0x10] sm:$0xff]  ;;  %p1412_p4 = pnand %p1411_p1, %p1572_p5  ;;  %p1417_p2 = por %p1416_p9, %p1415_p11 }
  0x44   : > { %377 = vmatpush.bf16.msra.mxu0 %v993_v28  ;;  %716 = vmatpush.bf16.msra.mxu2 %v1186_v1  ;;  %v265_v12 = vld [vmem:[%s1608_s14 + $0x60] sm:$0xff]  ;;  %v1190_v16 = vld [vmem:[#allocation7 + $0x50] sm:$0xff]  ;;  %v1181_v17 = vld [vmem:[#allocation7 + $0x8] sm:$0xff]  ;;  %v1472_v28 = vmov 1.0|1.0  }
  0x45   : > { %426 = vmatpush.bf16.msra.mxu1 %v997_v29  ;;  %765 = vmatpush.bf16.msra.mxu3 %v1194_v2  ;;  %v275_v14 = vpack.c.bf16 %v266_v13, %v265_v12  ;;  %v1189_v18 = vld [vmem:[#allocation7 + $0x48] sm:$0xff]  ;;  %v1180_v19 = vld [vmem:[#allocation7] sm:$0xff]  ;;  %v267_v21 = vld [vmem:[%s1608_s14 + $0x70] sm:$0xff]  ;;  %p1413_p8 = pneg %p1412_p4 }
  0x46   : > { %v1188_v20 = vld [vmem:[#allocation7 + $0x40] sm:$0xff]  ;;  %v268_v22 = vld [vmem:[%s1608_s14 + $0x78] sm:$0xff] }
  0x47   : > { %v276_v23 = vpack.c.bf16 %v268_v22, %v267_v21  ;;  %v1653_v57 = vld [vmem:[%s1728_s3] ss:$0 sm:$0xff]  ;;  %p1418_p10 = pnand %p1417_p2, %p1413_p8 }
  0x48   : > { %378 = vmatpush.bf16.msra.mxu0 %v985_v34  ;;  %717 = vmatpush.bf16.msra.mxu2 %v1185_v6 }
  0x49   : > { %427 = vmatpush.bf16.msra.mxu1 %v989_v35  ;;  %766 = vmatpush.bf16.msra.mxu3 %v1193_v7 }
  0x4c   : > { %379 = vmatpush.bf16.msra.mxu0 %v977_v40  ;;  %718 = vmatpush.bf16.msra.mxu2 %v1184_v8 }
  0x4d   : > { %428 = vmatpush.bf16.msra.mxu1 %v981_v41  ;;  %767 = vmatpush.bf16.msra.mxu3 %v1192_v9 }
  0x50   : > { %380 = vmatpush.bf16.msra.mxu0 %v969_v46  ;;  %719 = vmatpush.bf16.msra.mxu2 %v1183_v10 }
  0x51   : > { %429 = vmatpush.bf16.msra.mxu1 %v973_v49  ;;  %768 = vmatpush.bf16.msra.mxu3 %v1191_v11 }
  0x53   : > { %381 = vmatmul.bf16.vlgmr.msra.gmra.mxu0 %v269_v50 }
  0x54   : > { %430 = vmatmul.bf16.vlgmr.msra.gmra.mxu1 %v269_v50  ;;  %720 = vmatpush.bf16.msra.mxu2 %v1182_v15 }
  0x55   : > { %769 = vmatpush.bf16.msra.mxu3 %v1190_v16 }
  0x58   : > { %721 = vmatpush.bf16.msra.mxu2 %v1181_v17 }
  0x59   : > { %770 = vmatpush.bf16.msra.mxu3 %v1189_v18 }
  0x5c   : > { %722 = vmatpush.bf16.msra.mxu2 %v1180_v19 }
  0x5d   : > { %771 = vmatpush.bf16.msra.mxu3 %v1188_v20 }
  0x63   : > { %386 = vmatmul.bf16.gmra.mxu0 %v270_v53 }
  0x64   : > { %435 = vmatmul.bf16.gmra.mxu1 %v270_v53 }
  0x73   : > { %391 = vmatmul.bf16.gmra.mxu0 %v271_v56 }
  0x74   : > { %440 = vmatmul.bf16.gmra.mxu1 %v271_v56 }
  0x83   : > { %396 = vmatmul.bf16.gmra.mxu0 %v272_v59 }
  0x84   : > { %445 = vmatmul.bf16.gmra.mxu1 %v272_v59 }
  0x93   : > { %401 = vmatmul.bf16.gmra.mxu0 %v273_v62 }
  0x94   : > { %450 = vmatmul.bf16.gmra.mxu1 %v273_v62 }
  0xa3   : > { %406 = vmatmul.bf16.gmra.mxu0 %v274_v5 }
  0xa4   : > { %455 = vmatmul.bf16.gmra.mxu1 %v274_v5 }
  0xb3   : > { %411 = vmatmul.bf16.gmra.mxu0 %v275_v14 }
  0xb4   : > { %460 = vmatmul.bf16.gmra.mxu1 %v275_v14 }
  0xc3   : > { %416 = vmatmul.bf16.gmra.mxu0 %v276_v23 }
  0xc4   : > { %465 = vmatmul.bf16.gmra.mxu1 %v276_v23 }
  0xd0   : > { %v382_v24 = vpop.f32.mrf.mxu0 }
  0xd1   : > { %v431_v25 = vpop.f32.mrf.mxu1  ;;  %vm471_vm0 = vcmp.gt.f32.partialorder %v382_v24, 0.5 }
  0xd2   : > { %vm472_vm2 = vcmp.gt.f32.partialorder %v431_v25, 0.5 }
  0xd8   : > { %v384_v26 = vpop.f32.mrf.mxu0 }
  0xd9   : > { %vm473_vm1 = vcmp.gt.f32.partialorder %v384_v26, 0.5  ;;  %v433_v27 = vpop.f32.mrf.mxu1 }
  0xda   : > { %vm1126_vm3 = vmpackc.low %vm473_vm1, %vm471_vm0  ;;  %vm474_vm4 = vcmp.gt.f32.partialorder %v433_v27, 0.5 }
  0xdb   : > { %vm1142_vm5 = vmpackc.low %vm474_vm4, %vm472_vm2  ;;  %1127 = vmatmul.msk.bf16.vlgmr.msra.gmra.mxu2 %vm1126_vm3, %v1472_v28 }
  0xdc   : > { %1143 = vmatmul.msk.bf16.vlgmr.msra.gmra.mxu3 %vm1142_vm5, %v1472_v28 }
  0xe0   : > { %v387_v29 = vpop.f32.mrf.mxu0 }
  0xe1   : > { %v436_v30 = vpop.f32.mrf.mxu1  ;;  %vm475_vm6 = vcmp.gt.f32.partialorder %v387_v29, 0.5 }
  0xe2   : > { %vm476_vm8 = vcmp.gt.f32.partialorder %v436_v30, 0.5 }
  0xe8   : > { %v389_v31 = vpop.f32.mrf.mxu0 }
  0xe9   : > { %vm477_vm7 = vcmp.gt.f32.partialorder %v389_v31, 0.5  ;;  %v438_v32 = vpop.f32.mrf.mxu1 }
  0xea   : > { %vm1128_vm9 = vmpackc.low %vm477_vm7, %vm475_vm6  ;;  %vm478_vm10 = vcmp.gt.f32.partialorder %v438_v32, 0.5 }
  0xeb   : > { %vm1144_vm11 = vmpackc.low %vm478_vm10, %vm476_vm8  ;;  %1129 = vmatmul.msk.bf16.gmra.mxu2 %vm1128_vm9, %v1472_v28 }
  0xec   : > { %1145 = vmatmul.msk.bf16.gmra.mxu3 %vm1144_vm11, %v1472_v28 }
  0xf0   : > { %v392_v33 = vpop.f32.mrf.mxu0 }
  0xf1   : > { %v441_v34 = vpop.f32.mrf.mxu1  ;;  %vm479_vm12 = vcmp.gt.f32.partialorder %v392_v33, 0.5 }
  0xf2   : > { %vm480_vm14 = vcmp.gt.f32.partialorder %v441_v34, 0.5 }
  0xf8   : > { %v394_v35 = vpop.f32.mrf.mxu0 }
  0xf9   : > { %vm481_vm13 = vcmp.gt.f32.partialorder %v394_v35, 0.5  ;;  %v443_v36 = vpop.f32.mrf.mxu1 }
  0xfa   : > { %vm1130_vm15 = vmpackc.low %vm481_vm13, %vm479_vm12  ;;  %vm482_vm0 = vcmp.gt.f32.partialorder %v443_v36, 0.5 }
  0xfb   : > { %vm1146_vm1 = vmpackc.low %vm482_vm0, %vm480_vm14  ;;  %1131 = vmatmul.msk.bf16.gmra.mxu2 %vm1130_vm15, %v1472_v28 }
  0xfc   : > { %1147 = vmatmul.msk.bf16.gmra.mxu3 %vm1146_vm1, %v1472_v28 }
 0x100   : > { %v397_v37 = vpop.f32.mrf.mxu0 }
 0x101   : > { %v446_v38 = vpop.f32.mrf.mxu1  ;;  %vm483_vm2 = vcmp.gt.f32.partialorder %v397_v37, 0.5 }
 0x102   : > { %vm484_vm4 = vcmp.gt.f32.partialorder %v446_v38, 0.5 }
 0x108   : > { %v399_v39 = vpop.f32.mrf.mxu0 }
 0x109   : > { %vm485_vm3 = vcmp.gt.f32.partialorder %v399_v39, 0.5  ;;  %v448_v40 = vpop.f32.mrf.mxu1 }
 0x10a   : > { %vm1132_vm5 = vmpackc.low %vm485_vm3, %vm483_vm2  ;;  %vm486_vm6 = vcmp.gt.f32.partialorder %v448_v40, 0.5 }
 0x10b   : > { %vm1148_vm7 = vmpackc.low %vm486_vm6, %vm484_vm4  ;;  %1133 = vmatmul.msk.bf16.gmra.mxu2 %vm1132_vm5, %v1472_v28 }
 0x10c   : > { %1149 = vmatmul.msk.bf16.gmra.mxu3 %vm1148_vm7, %v1472_v28 }
 0x110   : > { %v402_v41 = vpop.f32.mrf.mxu0 }
 0x111   : > { %v451_v42 = vpop.f32.mrf.mxu1  ;;  %vm487_vm8 = vcmp.gt.f32.partialorder %v402_v41, 0.5 }
 0x112   : > { %vm488_vm10 = vcmp.gt.f32.partialorder %v451_v42, 0.5 }
 0x118   : > { %v404_v43 = vpop.f32.mrf.mxu0 }
 0x119   : > { %vm489_vm9 = vcmp.gt.f32.partialorder %v404_v43, 0.5  ;;  %v453_v44 = vpop.f32.mrf.mxu1 }
 0x11a   : > { %vm1134_vm11 = vmpackc.low %vm489_vm9, %vm487_vm8  ;;  %vm490_vm12 = vcmp.gt.f32.partialorder %v453_v44, 0.5 }
 0x11b   : > { %vm1150_vm13 = vmpackc.low %vm490_vm12, %vm488_vm10  ;;  %1135 = vmatmul.msk.bf16.gmra.mxu2 %vm1134_vm11, %v1472_v28 }
 0x11c   : > { %1151 = vmatmul.msk.bf16.gmra.mxu3 %vm1150_vm13, %v1472_v28 }
 0x120   : > { %v407_v45 = vpop.f32.mrf.mxu0 }
 0x121   : > { %v456_v46 = vpop.f32.mrf.mxu1  ;;  %vm491_vm14 = vcmp.gt.f32.partialorder %v407_v45, 0.5 }
 0x122   : > { %vm492_vm0 = vcmp.gt.f32.partialorder %v456_v46, 0.5 }
 0x128   : > { %v409_v47 = vpop.f32.mrf.mxu0 }
 0x129   : > { %vm493_vm15 = vcmp.gt.f32.partialorder %v409_v47, 0.5  ;;  %v458_v48 = vpop.f32.mrf.mxu1 }
 0x12a   : > { %vm1136_vm1 = vmpackc.low %vm493_vm15, %vm491_vm14  ;;  %vm494_vm2 = vcmp.gt.f32.partialorder %v458_v48, 0.5 }
 0x12b   : > { %vm1152_vm3 = vmpackc.low %vm494_vm2, %vm492_vm0  ;;  %1137 = vmatmul.msk.bf16.gmra.mxu2 %vm1136_vm1, %v1472_v28 }
 0x12c   : > { %1153 = vmatmul.msk.bf16.gmra.mxu3 %vm1152_vm3, %v1472_v28 }
 0x130   : > { %v412_v49 = vpop.f32.mrf.mxu0 }
 0x131   : > { %v461_v50 = vpop.f32.mrf.mxu1  ;;  %vm495_vm4 = vcmp.gt.f32.partialorder %v412_v49, 0.5 }
 0x132   : > { %vm496_vm6 = vcmp.gt.f32.partialorder %v461_v50, 0.5 }
 0x138   : > { %v414_v51 = vpop.f32.mrf.mxu0 }
 0x139   : > { %vm497_vm5 = vcmp.gt.f32.partialorder %v414_v51, 0.5  ;;  %v463_v52 = vpop.f32.mrf.mxu1 }
 0x13a   : > { %vm1138_vm7 = vmpackc.low %vm497_vm5, %vm495_vm4  ;;  %vm498_vm8 = vcmp.gt.f32.partialorder %v463_v52, 0.5 }
 0x13b   : > { %vm1154_vm9 = vmpackc.low %vm498_vm8, %vm496_vm6  ;;  %1139 = vmatmul.msk.bf16.gmra.mxu2 %vm1138_vm7, %v1472_v28 }
 0x13c   : > { %1155 = vmatmul.msk.bf16.gmra.mxu3 %vm1154_vm9, %v1472_v28 }
 0x140   : > { %v417_v53 = vpop.f32.mrf.mxu0 }
 0x141   : > { %v466_v54 = vpop.f32.mrf.mxu1  ;;  %vm499_vm10 = vcmp.gt.f32.partialorder %v417_v53, 0.5 }
 0x142   : > { %vm500_vm12 = vcmp.gt.f32.partialorder %v466_v54, 0.5 }
 0x148   : > { %v419_v55 = vpop.f32.mrf.mxu0 }
 0x149   : > { %vm501_vm11 = vcmp.gt.f32.partialorder %v419_v55, 0.5  ;;  %v468_v56 = vpop.f32.mrf.mxu1 }
 0x14a   : > { %vm1140_vm13 = vmpackc.low %vm501_vm11, %vm499_vm10  ;;  %vm502_vm14 = vcmp.gt.f32.partialorder %v468_v56, 0.5 }
 0x14b   : > { %vm1156_vm15 = vmpackc.low %vm502_vm14, %vm500_vm12  ;;  %1141 = vmatmul.msk.bf16.gmra.mxu2 %vm1140_vm13, %v1472_v28 }
 0x14c   : > { %1157 = vmatmul.msk.bf16.gmra.mxu3 %vm1156_vm15, %v1472_v28 }
 0x15e   : > { %v724_v58 = vpop.f32.mrf.mxu2 }
 0x15f   : > { %v725_v59 = vadd.f32 %v1653_v57, %v724_v58  ;;  %v773_v60 = vpop.f32.mrf.mxu3 }
 0x161   : > { %v774_v61 = vadd.f32 %v773_v60, %v725_v59 }
 0x163   : > { %1272 = vtanh.f32 %v774_v61 }
 0x166   : > { %v726_v62 = vpop.f32.mrf.mxu2 }
 0x167   : > { %v727_v63 = vadd.f32 %v1653_v57, %v726_v62  ;;  %v775_v0 = vpop.f32.mrf.mxu3 }
 0x169   : > { %v1273_v1 = vpop.eup %1272  ;;  %v776_v2 = vadd.f32 %v775_v0, %v727_v63 }
 0x16a   : > { %829 = vst [vmem:[%s1659_s6] sm:$0xff] %v1273_v1 }
 0x16b   : > { %1274 = vtanh.f32 %v776_v2 }
 0x16e   : > { %v729_v3 = vpop.f32.mrf.mxu2 }
 0x16f   : > { %v730_v4 = vadd.f32 %v1653_v57, %v729_v3  ;;  %v778_v5 = vpop.f32.mrf.mxu3 }
 0x171   : > { %v1275_v6 = vpop.eup %1274  ;;  %v779_v7 = vadd.f32 %v778_v5, %v730_v4 }
 0x172   : > { %830 = vst [vmem:[%s1659_s6 + $0x8] sm:$0xff] %v1275_v6 }
 0x173   : > { %1276 = vtanh.f32 %v779_v7 }
 0x176   : > { %v731_v8 = vpop.f32.mrf.mxu2 }
 0x177   : > { %v732_v9 = vadd.f32 %v1653_v57, %v731_v8  ;;  %v780_v10 = vpop.f32.mrf.mxu3 }
 0x179   : > { %v1277_v11 = vpop.eup %1276  ;;  %v781_v12 = vadd.f32 %v780_v10, %v732_v9 }
 0x17a   : > { %831 = vst [vmem:[%s1659_s6 + $0x10] sm:$0xff] %v1277_v11 }
 0x17b   : > { %1278 = vtanh.f32 %v781_v12 }
 0x17e   : > { %v734_v13 = vpop.f32.mrf.mxu2 }
 0x17f   : > { %v735_v14 = vadd.f32 %v1653_v57, %v734_v13  ;;  %v783_v15 = vpop.f32.mrf.mxu3 }
 0x181   : > { %v1279_v16 = vpop.eup %1278  ;;  %v784_v17 = vadd.f32 %v783_v15, %v735_v14 }
 0x182   : > { %832 = vst [vmem:[%s1659_s6 + $0x18] sm:$0xff] %v1279_v16 }
 0x183   : > { %1280 = vtanh.f32 %v784_v17 }
 0x186   : > { %v736_v18 = vpop.f32.mrf.mxu2 }
 0x187   : > { %v737_v19 = vadd.f32 %v1653_v57, %v736_v18  ;;  %v785_v20 = vpop.f32.mrf.mxu3 }
 0x189   : > { %v1281_v21 = vpop.eup %1280  ;;  %v786_v22 = vadd.f32 %v785_v20, %v737_v19 }
 0x18a   : > { %833 = vst [vmem:[%s1659_s6 + $0x20] sm:$0xff] %v1281_v21 }
 0x18b   : > { %1282 = vtanh.f32 %v786_v22 }
 0x18e   : > { %v739_v23 = vpop.f32.mrf.mxu2 }
 0x18f   : > { %v740_v24 = vadd.f32 %v1653_v57, %v739_v23  ;;  %v788_v25 = vpop.f32.mrf.mxu3 }
 0x191   : > { %v1283_v26 = vpop.eup %1282  ;;  %v789_v27 = vadd.f32 %v788_v25, %v740_v24 }
 0x192   : > { %834 = vst [vmem:[%s1659_s6 + $0x28] sm:$0xff] %v1283_v26 }
 0x193   : > { %1284 = vtanh.f32 %v789_v27 }
 0x196   : > { %v741_v28 = vpop.f32.mrf.mxu2 }
 0x197   : > { %v742_v29 = vadd.f32 %v1653_v57, %v741_v28  ;;  %v790_v30 = vpop.f32.mrf.mxu3 }
 0x199   : > { %v1285_v31 = vpop.eup %1284  ;;  %v791_v32 = vadd.f32 %v790_v30, %v742_v29 }
 0x19a   : > { %835 = vst [vmem:[%s1659_s6 + $0x30] sm:$0xff] %v1285_v31 }
 0x19b   : > { %1286 = vtanh.f32 %v791_v32 }
 0x19e   : > { %v744_v33 = vpop.f32.mrf.mxu2 }
 0x19f   : > { %v745_v34 = vadd.f32 %v1653_v57, %v744_v33  ;;  %v793_v35 = vpop.f32.mrf.mxu3 }
 0x1a1   : > { %v1287_v36 = vpop.eup %1286  ;;  %v794_v37 = vadd.f32 %v793_v35, %v745_v34 }
 0x1a2   : > { %836 = vst [vmem:[%s1659_s6 + $0x38] sm:$0xff] %v1287_v36 }
 0x1a3   : > { %1288 = vtanh.f32 %v794_v37 }
 0x1a6   : > { %v746_v38 = vpop.f32.mrf.mxu2 }
 0x1a7   : > { %v747_v39 = vadd.f32 %v1653_v57, %v746_v38  ;;  %v795_v40 = vpop.f32.mrf.mxu3 }
 0x1a9   : > { %v1289_v41 = vpop.eup %1288  ;;  %v796_v42 = vadd.f32 %v795_v40, %v747_v39 }
 0x1aa   : > { %837 = vst [vmem:[%s1659_s6 + $0x40] sm:$0xff] %v1289_v41 }
 0x1ab   : > { %1290 = vtanh.f32 %v796_v42 }
 0x1ae   : > { %v749_v43 = vpop.f32.mrf.mxu2 }
 0x1af   : > { %v750_v44 = vadd.f32 %v1653_v57, %v749_v43  ;;  %v798_v45 = vpop.f32.mrf.mxu3 }
 0x1b1   : > { %v1291_v46 = vpop.eup %1290  ;;  %v799_v47 = vadd.f32 %v798_v45, %v750_v44 }
 0x1b2   : > { %838 = vst [vmem:[%s1659_s6 + $0x48] sm:$0xff] %v1291_v46 }
 0x1b3   : > { %1292 = vtanh.f32 %v799_v47 }
 0x1b6   : > { %v751_v48 = vpop.f32.mrf.mxu2 }
 0x1b7   : > { %v752_v49 = vadd.f32 %v1653_v57, %v751_v48  ;;  %v800_v50 = vpop.f32.mrf.mxu3 }
 0x1b9   : > { %v1293_v51 = vpop.eup %1292  ;;  %v801_v52 = vadd.f32 %v800_v50, %v752_v49 }
 0x1ba   : > { %839 = vst [vmem:[%s1659_s6 + $0x50] sm:$0xff] %v1293_v51 }
 0x1bb   : > { %1294 = vtanh.f32 %v801_v52 }
 0x1be   : > { %v754_v53 = vpop.f32.mrf.mxu2 }
 0x1bf   : > { %v755_v54 = vadd.f32 %v1653_v57, %v754_v53  ;;  %v803_v55 = vpop.f32.mrf.mxu3 }
 0x1c1   : > { %v1295_v56 = vpop.eup %1294  ;;  %v804_v58 = vadd.f32 %v803_v55, %v755_v54 }
 0x1c2   : > { %840 = vst [vmem:[%s1659_s6 + $0x58] sm:$0xff] %v1295_v56 }
 0x1c3   : > { %1296 = vtanh.f32 %v804_v58 }
 0x1c6   : > { %v756_v59 = vpop.f32.mrf.mxu2 }
 0x1c7   : > { %v757_v60 = vadd.f32 %v1653_v57, %v756_v59  ;;  %v805_v61 = vpop.f32.mrf.mxu3 }
 0x1c9   : > { %v1297_v62 = vpop.eup %1296  ;;  %v806_v63 = vadd.f32 %v805_v61, %v757_v60 }
 0x1ca   : > { %841 = vst [vmem:[%s1659_s6 + $0x60] sm:$0xff] %v1297_v62 }
 0x1cb   : > { %1298 = vtanh.f32 %v806_v63 }
 0x1ce   : > { %v759_v0 = vpop.f32.mrf.mxu2 }
 0x1cf   : > { %v760_v1 = vadd.f32 %v1653_v57, %v759_v0  ;;  %v808_v2 = vpop.f32.mrf.mxu3 }
 0x1d1   : > { %v1299_v3 = vpop.eup %1298  ;;  %v809_v4 = vadd.f32 %v808_v2, %v760_v1 }
 0x1d2   : > { %842 = vst [vmem:[%s1659_s6 + $0x68] sm:$0xff] %v1299_v3 }
 0x1d3   : > { %1300 = vtanh.f32 %v809_v4 }
 0x1d6   : > { %v761_v5 = vpop.f32.mrf.mxu2 }
 0x1d7   : > { %v762_v6 = vadd.f32 %v1653_v57, %v761_v5  ;;  %v810_v7 = vpop.f32.mrf.mxu3 }
 0x1d9   : > { %v1301_v8 = vpop.eup %1300  ;;  %v811_v9 = vadd.f32 %v810_v7, %v762_v6 }
 0x1da   : > { %843 = vst [vmem:[%s1659_s6 + $0x70] sm:$0xff] %v1301_v8 }
 0x1db   : > { %1302 = vtanh.f32 %v811_v9 }
 0x1e1   : > { %v1303_v10 = vpop.eup %1302 }
 0x1e2   : > { %844 = vst [vmem:[%s1659_s6 + $0x78] sm:$0xff] %v1303_v10 }
 0x1e3   : > { %1421 = shalt.err (!%p1418_p10)
}
 0x1e4   : > { %s1473_s24 = smov 128   ;;  %s1474_s21 = smov 8  }
 0x1e5   : > { %1207 = dma.vmem_to_hbm [thread:$0]  (%p1572_p5), %s859_s11, 2048, %s861_s27, %s846_s25, %s1473_s24, %s1473_s24, %s1474_s21  }
 0x1e6 PF: > { %s875_s26 = sand.u32 1, %s1452_s15   ;;  %p1735_p12 = scmp.ge.s32.totalorder %s1464_s18, 2 }
 0x1e7   : > { %s876_s6 = scalar_lea.sflag [#allocation4], %s875_s26 }
 0x1e8   : > { %p1221_p13 = pnand %p1735_p12, %p1535_p6 }
 0x1ea   : > { %p1222_p0 = pneg %p1221_p13 }
 0x1ec   : > { %1447 = dma.done.wait (%p1222_p0), %s876_s6, 2048  }
 0x1ed   : > { %1449 = vsyncadd (%p1222_p0), %s876_s6, 4294965248  ;;  %p18_p3 = scmp.ge.s32.totalorder %s1559_s12, 4   ;;  %s1736_s15 = smov %s1456_s16 }
 0x1ee   : > { %s1737_s16 = smov %s1460_s17  ;;  %s1738_s17 = smov %s1568_s20 }
 0x1ef   : > { %s1739_s18 = smov %s1559_s12  ;;  %20 = sbr.rel (!%p18_p3) target bundleno = 6 (0x6), region = 89 }
 0x1f4   :  { %882 = vsyncpa [#allocation3], 1 }
 0x1f5   :  { %884 = vsyncpa [#allocation3 + $0x1], 1 }
 0x1f6   :  { %885 = vsyncpa [#allocation6], 1 }
 0x1f7   :  { %886 = vsyncpa [#allocation4], 1 }
 0x1f8   :  { %888 = vsyncpa [#allocation4 + $0x1], 1 }

</bundles_post_ra>
